<compile_context>
chip_gen: v5e
topology: v5e:2x2
jax: 0.10.0
libtpu: 0.0.40
codegen_flags: <defaults>
</compile_context>

<pallas_src>
import functools

import jax
import jax.numpy as jnp
from jax.experimental import pallas as pl
from jax.experimental.pallas import tpu as pltpu


_TARGET_BUF_BYTES = 1 << 20     # ~1 MiB per pipeline buffer
_MIN_GRID_STEPS = 8             # pipeline overlap + v7x megacore load balance
_MAX_IMAGES_PER_BLOCK = 16      # bound static unroll / vreg pressure in kernel
_MXU_MIN_C = 8                  # below this the MXU would be ~idle; use VPU FMAs


def _round_up(a, m):
    return (a + m - 1) // m * m


def _attention_gate_kernel(x_ref, w_ref, b_ref, o_ref, *, use_mxu):
    # x_ref: (t_n, C, t_hw)   activation tile (images x channels x spatial)
    # w_ref: (C, C)           1x1-conv weight, laid out (C_out, C_in)
    # b_ref: (C, 1)           bias (f32)
    # o_ref: (t_n, C, t_hw)
    w = w_ref[...]
    b = b_ref[...]
    t_n = x_ref.shape[0]
    c = w.shape[0]

    if use_mxu:
        # MXU path: one small (C,C)x(C,t_hw) matmul per packed image,
        # f32 accumulation via preferred_element_type.
        for ni in range(t_n):                      # static unroll, t_n is capped
            xi = x_ref[ni]                         # (C, t_hw)
            z = jnp.dot(w, xi, preferred_element_type=jnp.float32)
            g = jax.nn.sigmoid(z + b)              # gate in f32
            o_ref[ni] = (g * xi.astype(jnp.float32)).astype(o_ref.dtype)
    else:
        # Tiny-C path: the conv is C broadcast FMAs on the VPU, vectorized over
        # the packed-image axis (only C unrolled terms, independent of t_n).
        x = x_ref[...].astype(jnp.float32)         # (t_n, C, t_hw)
        wf = w.astype(jnp.float32)
        z = x[:, 0:1, :] * wf[None, :, 0:1]
        for ci in range(1, c):
            z = z + x[:, ci:ci + 1, :] * wf[None, :, ci:ci + 1]
        g = jax.nn.sigmoid(z + b[None, :, :])      # gate in f32
        o_ref[...] = (g * x).astype(o_ref.dtype)


def attention_gate(x_nchw, weight, bias):
    """AttentionGate forward: sigmoid(conv1x1(x)) * x.

    x_nchw: (N, C, H, W)
    weight: (C_out, C_in)  -- the 1x1 conv kernel, squeezed
    bias:   (C_out,)
    """
    N, C, H, W = x_nchw.shape
    HW = H * W
    dtype = x_nchw.dtype
    itemsize = jnp.dtype(dtype).itemsize

    x3 = x_nchw.reshape(N, C, HW)                  # free reshape (no data movement)

    use_mxu = C >= _MXU_MIN_C
    # MXU path: keep weight in the activation dtype (real bf16 x bf16 fast
    # path); VPU path: keep weight in f32 (elementwise math stays f32).
    w_dtype = dtype if (use_mxu and jnp.issubdtype(dtype, jnp.floating)) else jnp.float32
    w = weight.astype(w_dtype)
    b = bias.astype(jnp.float32).reshape(C, 1)

    # ---- tile sizing (sublane-padding aware) ----
    sublanes = max(8, 32 // itemsize)              # f32: 8, bf16: 16, int8: 32
    c_pad = _round_up(C, sublanes)

    if HW <= 128:
        t_hw = HW                                  # full extent (always a legal block)
    else:
        # Largest multiple of 128 whose (padded) block fits the per-buffer target.
        max_lanes = max(128, (_TARGET_BUF_BYTES // (c_pad * itemsize)) // 128 * 128)
        t_hw = min(_round_up(HW, 128), max_lanes)
        # Keep enough grid steps for DMA/compute overlap and megacore sharding.
        while N * pl.cdiv(HW, t_hw) < _MIN_GRID_STEPS and t_hw > 512:
            t_hw = max(512, _round_up(t_hw // 2, 128))

    # If one block already covers all of H*W, pack several images per block so
    # tiny shapes are not dominated by per-grid-step overhead.
    t_n = 1
    if N > 1 and pl.cdiv(HW, t_hw) == 1:
        per_image_bytes = c_pad * _round_up(t_hw, 128) * itemsize
        t_n = int(min(N, _MAX_IMAGES_PER_BLOCK,
                      max(1, _TARGET_BUF_BYTES // per_image_bytes)))
        while t_n > 1 and pl.cdiv(N, t_n) * pl.cdiv(HW, t_hw) < _MIN_GRID_STEPS:
            t_n = max(1, t_n // 2)

    grid = (pl.cdiv(N, t_n), pl.cdiv(HW, t_hw))

    # ---- generation-aware VMEM limit (working set is ~4x the ~1 MiB buffers) ----
    try:
        vmem_cap = int(pltpu.get_tpu_info().vmem_capacity_bytes)
    except Exception:
        vmem_cap = 64 * 1024 * 1024                # conservative (v7x per-TC)
    w_bytes = _round_up(C, sublanes) * _round_up(C, 128) * jnp.dtype(w_dtype).itemsize
    est_ws = (4 * t_n * c_pad * _round_up(t_hw, 128) * itemsize
              + 2 * w_bytes + (1 << 20))
    vmem_limit = int(min(vmem_cap // 2, max(32 * 1024 * 1024, 2 * est_ws)))

    kernel = functools.partial(_attention_gate_kernel, use_mxu=use_mxu)

    out3 = pl.pallas_call(
        kernel,
        out_shape=jax.ShapeDtypeStruct((N, C, HW), dtype),
        grid_spec=pltpu.PrefetchScalarGridSpec(
            num_scalar_prefetch=0,
            grid=grid,
            in_specs=[
                pl.BlockSpec((t_n, C, t_hw), lambda ni, ji: (ni, 0, ji)),  # x tile
                pl.BlockSpec((C, C), lambda ni, ji: (0, 0)),               # weight (grid-invariant)
                pl.BlockSpec((C, 1), lambda ni, ji: (0, 0)),               # bias   (grid-invariant)
            ],
            out_specs=pl.BlockSpec((t_n, C, t_hw), lambda ni, ji: (ni, 0, ji)),
        ),
        compiler_params=pltpu.CompilerParams(
            dimension_semantics=("parallel", "parallel"),
            vmem_limit_bytes=vmem_limit,
        ),
    )(x3, w, b)

    return out3.reshape(N, C, H, W)                # free reshape back to NCHW


if __name__ == "__main__":
    key = jax.random.PRNGKey(0)
    N, C, H, W = 2, 4, 16, 16

    k_x, k_w, k_b = jax.random.split(key, 3)
    x = jax.random.normal(k_x, (N, C, H, W), dtype=jnp.float32)
    # deterministic synthetic parameters of Conv2d(C, C, kernel_size=1),
    # kernel squeezed to (C_out, C_in)
    weight = jax.random.normal(k_w, (C, C), dtype=jnp.float32) * 0.1
    bias = jax.random.normal(k_b, (C,), dtype=jnp.float32) * 0.1

    out = jax.block_until_ready(attention_gate(x, weight, bias))

    # reference check in plain JAX (1x1 conv == per-pixel channel matmul)
    z = jnp.einsum("oc,nchw->nohw", weight, x) + bias[None, :, None, None]
    ref = jax.nn.sigmoid(z) * x
    assert out.shape == ref.shape
    assert jnp.allclose(out, ref, atol=1e-5, rtol=1e-5), "mismatch vs reference"

    print("KERNEL_OK")
</pallas_src>

<mosaic_0001>
module attributes {stable_mosaic.version = 11 : i64} {
  func.func @_attention_gate_kernel(%arg0: i32, %arg1: i32, %arg2: memref<1x4x256xf32, #tpu.memory_space<vmem>>, %arg3: memref<4x4xf32, #tpu.memory_space<vmem>>, %arg4: memref<4x1xf32, #tpu.memory_space<vmem>>, %arg5: memref<1x4x256xf32, #tpu.memory_space<vmem>>) attributes {dimension_semantics = [#tpu.dimension_semantics<parallel>, #tpu.dimension_semantics<parallel>], iteration_bounds = array<i64: 2, 1>, scalar_prefetch = 0 : i64, scratch_operands = 0 : i64, tpu.core_type = #tpu.core_type<tc>, window_params = [{transform_indices = @transform_0, window_bounds = array<i64: 1, 4, 256>}, {pipeline_mode = #tpu.pipeline_mode<synchronous>, transform_indices = @transform_1, window_bounds = array<i64: 4, 4>}, {pipeline_mode = #tpu.pipeline_mode<synchronous>, transform_indices = @transform_2, window_bounds = array<i64: 4, 1>}, {transform_indices = @transform_3, window_bounds = array<i64: 1, 4, 256>}]} {
    %c0 = arith.constant 0 : index
    %c0_0 = arith.constant 0 : index
    %0 = vector.load %arg3[%c0, %c0_0] : memref<4x4xf32, #tpu.memory_space<vmem>>, vector<4x4xf32>
    %c0_1 = arith.constant 0 : index
    %c0_2 = arith.constant 0 : index
    %1 = vector.load %arg4[%c0_1, %c0_2] : memref<4x1xf32, #tpu.memory_space<vmem>>, vector<4x1xf32>
    %c0_3 = arith.constant 0 : index
    %c0_4 = arith.constant 0 : index
    %c0_5 = arith.constant 0 : index
    %2 = vector.load %arg2[%c0_3, %c0_4, %c0_5] : memref<1x4x256xf32, #tpu.memory_space<vmem>>, vector<1x4x256xf32>
    %3 = vector.extract_strided_slice %2 {offsets = [0, 0, 0], sizes = [1, 1, 256], strides = [1, 1, 1]} : vector<1x4x256xf32> to vector<1x1x256xf32>
    %4 = vector.extract_strided_slice %0 {offsets = [0, 0], sizes = [4, 1], strides = [1, 1]} : vector<4x4xf32> to vector<4x1xf32>
    %5 = vector.shape_cast %4 : vector<4x1xf32> to vector<1x4x1xf32>
    %6 = vector.broadcast %3 : vector<1x1x256xf32> to vector<1x4x256xf32>
    %7 = vector.broadcast %5 : vector<1x4x1xf32> to vector<1x4x256xf32>
    %8 = arith.mulf %6, %7 : vector<1x4x256xf32>
    %9 = vector.extract_strided_slice %2 {offsets = [0, 1, 0], sizes = [1, 1, 256], strides = [1, 1, 1]} : vector<1x4x256xf32> to vector<1x1x256xf32>
    %10 = vector.extract_strided_slice %0 {offsets = [0, 1], sizes = [4, 1], strides = [1, 1]} : vector<4x4xf32> to vector<4x1xf32>
    %11 = vector.shape_cast %10 : vector<4x1xf32> to vector<1x4x1xf32>
    %12 = vector.broadcast %9 : vector<1x1x256xf32> to vector<1x4x256xf32>
    %13 = vector.broadcast %11 : vector<1x4x1xf32> to vector<1x4x256xf32>
    %14 = arith.mulf %12, %13 : vector<1x4x256xf32>
    %15 = arith.addf %8, %14 : vector<1x4x256xf32>
    %16 = vector.extract_strided_slice %2 {offsets = [0, 2, 0], sizes = [1, 1, 256], strides = [1, 1, 1]} : vector<1x4x256xf32> to vector<1x1x256xf32>
    %17 = vector.extract_strided_slice %0 {offsets = [0, 2], sizes = [4, 1], strides = [1, 1]} : vector<4x4xf32> to vector<4x1xf32>
    %18 = vector.shape_cast %17 : vector<4x1xf32> to vector<1x4x1xf32>
    %19 = vector.broadcast %16 : vector<1x1x256xf32> to vector<1x4x256xf32>
    %20 = vector.broadcast %18 : vector<1x4x1xf32> to vector<1x4x256xf32>
    %21 = arith.mulf %19, %20 : vector<1x4x256xf32>
    %22 = arith.addf %15, %21 : vector<1x4x256xf32>
    %23 = vector.extract_strided_slice %2 {offsets = [0, 3, 0], sizes = [1, 1, 256], strides = [1, 1, 1]} : vector<1x4x256xf32> to vector<1x1x256xf32>
    %24 = vector.extract_strided_slice %0 {offsets = [0, 3], sizes = [4, 1], strides = [1, 1]} : vector<4x4xf32> to vector<4x1xf32>
    %25 = vector.shape_cast %24 : vector<4x1xf32> to vector<1x4x1xf32>
    %26 = vector.broadcast %23 : vector<1x1x256xf32> to vector<1x4x256xf32>
    %27 = vector.broadcast %25 : vector<1x4x1xf32> to vector<1x4x256xf32>
    %28 = arith.mulf %26, %27 : vector<1x4x256xf32>
    %29 = arith.addf %22, %28 : vector<1x4x256xf32>
    %30 = vector.shape_cast %1 : vector<4x1xf32> to vector<1x4x1xf32>
    %31 = vector.broadcast %30 : vector<1x4x1xf32> to vector<1x4x256xf32>
    %32 = arith.addf %29, %31 : vector<1x4x256xf32>
    %33 = arith.negf %32 : vector<1x4x256xf32>
    %34 = math.exp %33 : vector<1x4x256xf32>
    %cst = arith.constant 1.000000e+00 : f32
    %35 = vector.broadcast %cst : f32 to vector<1x4x256xf32>
    %36 = arith.addf %35, %34 : vector<1x4x256xf32>
    %37 = arith.divf %35, %36 : vector<1x4x256xf32>
    %38 = arith.mulf %37, %2 : vector<1x4x256xf32>
    %c0_6 = arith.constant 0 : index
    %c0_7 = arith.constant 0 : index
    %c0_8 = arith.constant 0 : index
    %39 = vector.load %arg5[%c0_6, %c0_7, %c0_8] : memref<1x4x256xf32, #tpu.memory_space<vmem>>, vector<1x4x256xf32>
    tpu.vector_store %arg5[%c0_6, %c0_7, %c0_8], %38 {strides = array<i32>} : memref<1x4x256xf32, #tpu.memory_space<vmem>>, vector<1x4x256xf32>,
    return
  }
  func.func @transform_0(%arg0: i32, %arg1: i32) -> (i32, i32, i32) {
    %c0_i32 = arith.constant 0 : i32
    %c0_i32_0 = arith.constant 0 : i32
    return %arg0, %c0_i32, %arg1 : i32, i32, i32
  }
  func.func @transform_1(%arg0: i32, %arg1: i32) -> (i32, i32) {
    %c0_i32 = arith.constant 0 : i32
    %c0_i32_0 = arith.constant 0 : i32
    %c0_i32_1 = arith.constant 0 : i32
    return %c0_i32, %c0_i32_0 : i32, i32
  }
  func.func @transform_2(%arg0: i32, %arg1: i32) -> (i32, i32) {
    %c0_i32 = arith.constant 0 : i32
    %c0_i32_0 = arith.constant 0 : i32
    %c0_i32_1 = arith.constant 0 : i32
    return %c0_i32, %c0_i32_0 : i32, i32
  }
  func.func @transform_3(%arg0: i32, %arg1: i32) -> (i32, i32, i32) {
    %c0_i32 = arith.constant 0 : i32
    %c0_i32_0 = arith.constant 0 : i32
    return %arg0, %c0_i32, %arg1 : i32, i32, i32
  }
}

</mosaic_0001>

<bundles_post_ra>
// kernel: tpu_custom_call.1
= control target key start
LH: loop header
LB: loop body
LE: loop exit
PB: predicated region body
PF: predicated region fallthrough
CT: control target
= control target key end

     0   :  { %8 = vsyncpa [#allocation3], 0  ;;  %s797_s0 = inlined_call_operand.hbm [shape: f32[2,4,256], index: 0, kind: input, shape index: {}]   ;;  %s798_s1 = inlined_call_operand.vmem [shape: f32[4,4], index: 1, kind: input, shape index: {}]   ;;  %s799_s2 = inlined_call_operand.vmem [shape: f32[4,1], index: 2, kind: input, shape index: {}]   ;;  %s800_s3 = inlined_call_operand.hbm [shape: f32[2,4,256], index: 3, kind: output, shape index: {}]  }
   0x1   :  { %10 = vsyncpa [#allocation3 + $0x1], 0 }
   0x2   :  { %11 = vsyncpa [#allocation4], 0 }
   0x3   :  { %13 = vsyncpa [#allocation4 + $0x1], 0  ;;  %s667_s12 = smov 0   ;;  %s669_s13 = smov 0  }
   0x4   :  { %s671_s14 = smov 0   ;;  %s673_s15 = smov 0  }
   0x5   :  { %s675_s16 = smov 0   ;;  %s677_s17 = smov 0  }
   0x6 LB: > { %s430_s18 = sadd.s32 4294967295, %s641_s17   ;;  %s431_s19 = sadd.s32 4294967294, %s641_s17   ;;  %s641_s17 = sphi %s677_s17, %s19_s17   ;;  %s637_s16 = sphi %s675_s16, %s809_s16   ;;  %s633_s15 = sphi %s673_s15, %s808_s15   ;;  %s629_s14 = sphi %s671_s14, %s807_s14   ;;  %s625_s13 = sphi %s669_s13, %s806_s13   ;;  %s621_s12 = sphi %s667_s12, %s805_s12  }
   0x7   : > { %s31_s20 = sadd.s32 1, %s637_s16  ;;  %s40_s21 = sadd.s32 1, %s629_s14 }
   0x8   : > { %p33_p0 = scmp.ge.s32.totalorder %s31_s20, 2  ;;  %p47_p1 = scmp.ne.s32.totalorder %s629_s14, %s625_s13 }
   0x9   : > { %p48_p2 = scmp.eq.s32.totalorder %s641_s17, 0  ;;  %p53_p3 = scmp.ne.s32.totalorder %s625_s13, %s621_s12 }
   0xa   : > { %s811_s20 = smov (%p33_p0, %s31_s20), 0  ;;  %p54_p5 = scmp.eq.s32.totalorder %s430_s18, 0 }
   0xb   : > { %p708_p4 = por %p48_p2, %p47_p1  ;;  %s35_s23 = ssub.s32 %s637_s16, %s811_s20 }
   0xc   : > { %p121_p6 = scmp.eq.s32.totalorder %s430_s18, 1  ;;  %p38_p7 = scmp.eq.s32.totalorder %s35_s23, 0 }
   0xd   : > { %p714_p8 = por %p54_p5, %p53_p3  ;;  %p127_p10 = scmp.eq.s32.totalorder %s431_s19, 1 }
   0xe   : > { %p718_p9 = por %p121_p6, %p47_p1  ;;  %p433_p12 = scmp.ge.s32.totalorder %s641_s17, 2 }
   0xf   : > { %s723_s26 = scalar_select %p38_p7, %s629_s14, %s40_s21  }
  0x10   : > { %p725_p11 = por %p127_p10, %p53_p3  ;;  %p461_p13 = scmp.lt.s32.totalorder %s641_s17, 2 }
  0x11   : > { %s153_s28 = sand.u32 1, %s629_s14   ;;  %s447_s30 = sshll.u32 %s637_s16, 3 }
  0x12   : > { %s434_s29 = sshll.u32 %s153_s28, 3  ;;  %s164_s6 = scalar_lea.hbm %s797_s0, %s447_s30 }
  0x13   : > { %s157_s7 = scalar_lea.vmem [#allocation2], %s434_s29  ;;  %s166_s9 = sshll.u32 %s164_s6, 4  ;;  %s167_s9 = int_to_ptr.hbm [resolvable:$true] %s166_s9 }
  0x14   : > { %s168_s8 = sshll.u32 %s157_s7, 4  ;;  %p454_p0 = pnand %p461_p13, %p708_p4  ;;  %s169_s8 = int_to_ptr.vmem [resolvable:$true] %s168_s8 }
  0x15   : > { %p437_p1 = scmp.ge.s32.totalorder %s641_s17, 1  ;;  %p173_p2 = scmp.lt.s32.totalorder %s641_s17, 3 }
  0x16   : > { %s154_s10 = scalar_lea.sflag [#allocation3], %s153_s28 }
  0x17   : > { %456 = dma.hbm_to_vmem [thread:$0]  (!%p454_p0), %s167_s9, 128, %s169_s8, %s154_s10  }
  0x18   : > { %p174_p3 = pnand %p437_p1, %p173_p2 }
  0x19   : > { %s741_s11 = sand.u32 (!%p174_p3), 1, %s625_s13  }
  0x1a   : > { %177 = sbr.rel (%p174_p3) target bundleno = 205 (0xcd), region = 32  ;;  %s438_s18 = sshll.u32 (!%p174_p3), %s741_s11, 3 }
  0x1b   : > { %s180_s19 = scalar_lea.sflag (!%p174_p3), [#allocation3], %s741_s11  ;;  %s183_s21 = scalar_lea.vmem (!%p174_p3), [#allocation2], %s438_s18 }
  0x1f   : > { %612 = dma.done.wait (%p714_p8), %s180_s19, 128  }
  0x20   : > { %614 = vsyncadd (%p714_p8), %s180_s19, 4294967168  ;;  %v643_v0 = vmov 0   ;;  %v644_v1 = vmov 2   ;;  %v211_v2 = vld [vmem:[%s183_s21] sm:$0xff]  ;;  %v209_v3 = vld [vmem:[%s798_s1] sm:$0xf] }
  0x21   : > { %515 = vset.pattern.permute.xlu0 %v643_v0  ;;  %517 = vset.pattern.permute.xlu1 %v644_v1  ;;  %v210_v4 = vld [vmem:[%s799_s2] sm:$0xf]  ;;  %313 = vst [vmem:[#allocation1] ss:$2 sm:$0xff] %v211_v2  ;;  %v645_v5 = vmov 1   ;;  %v646_v6 = vmov 3  }
  0x22   : > { %519 = vset.pattern.permute.xlu2 %v643_v0  ;;  %221 = vperm.xlu0 %515, %v209_v3   ;;  %v213_v9 = vperm.slane %v211_v2, 0  ;;  %v214_v10 = vperm.slane %v211_v2, 4  ;;  %v226_v11 = vperm.slane %v211_v2, 1  ;;  %v227_v12 = vperm.slane %v211_v2, 5  ;;  %s448_s24 = sshll.u32 %s633_s15, 3  ;;  %s206_s15 = scalar_lea.vmem [#allocation5], %s438_s18 }
  0x23   : > { %247 = vperm.xlu1 %517, %v209_v3   ;;  %270 = vperm.xlu2 %519, %v210_v4   ;;  %v240_v13 = vperm.slane %v211_v2, 2  ;;  %v241_v14 = vperm.slane %v211_v2, 6  ;;  %v254_v15 = vperm.slane %v211_v2, 3  ;;  %v255_v16 = vperm.slane %v211_v2, 7  ;;  %s341_s5 = scalar_lea.hbm %s800_s3, %s448_s24  ;;  %s343_s6 = sshll.u32 %s206_s15, 4  ;;  %s344_s6 = int_to_ptr.vmem [resolvable:$true] %s343_s6 }
  0x24   : > { %v217_v17 = vperm.slane %v213_v9, 0  ;;  %v218_v18 = vperm.slane %v214_v10, 0  ;;  %v230_v19 = vperm.slane %v226_v11, 1  ;;  %v231_v20 = vperm.slane %v227_v12, 1  ;;  %s345_s7 = sshll.u32 %s341_s5, 4  ;;  %s328_s8 = scalar_lea.sflag [#allocation4], %s741_s11  ;;  %s346_s7 = int_to_ptr.hbm [resolvable:$true] %s345_s7 }
  0x25   : > { %v244_v21 = vperm.slane %v240_v13, 2  ;;  %v245_v22 = vperm.slane %v241_v14, 2  ;;  %v258_v23 = vperm.slane %v254_v15, 3  ;;  %v259_v24 = vperm.slane %v255_v16, 3  ;;  %s573_s9 = sshra.s32 %s346_s7, 4  ;;  %s579_s18 = scalar_lea.hbm %s800_s3, 16  ;;  %s574_s9 = int_to_ptr.hbm [resolvable:$true] %s573_s9 }
  0x26   : > { %vm323_vm8 = vcmask 1043456   ;;  %s575_s10 = scalar_lea.hbm %s574_s9, 8  ;;  %p580_p7 = scmp.lt.s32.totalorder %s574_s9, %s800_s3 }
  0x27   : > { %p576_p4 = scmp.ne.s32.totalorder %s574_s9, %s575_s10  ;;  %p581_p8 = scmp.lt.s32.totalorder %s579_s18, %s575_s10 }
  0x29   : > { %p577_p5 = pnand %p576_p4, %p718_p9  ;;  %p582_p10 = por %p581_p8, %p580_p7 }
  0x2a   : > { %516 = vset.pattern.permute.xlu0 %v645_v5 }
  0x2b   : > { %518 = vset.pattern.permute.xlu1 %v646_v6  ;;  %233 = vperm.xlu0 %516, %v209_v3   ;;  %p578_p6 = pneg %p577_p5 }
  0x2c   : > { %261 = vperm.xlu1 %518, %v209_v3   ;;  %v315_v3 = vld.sshfl [vmem:[#allocation1 + $0x8] sm:$0xff pattern:$0x75316420] }
  0x2d   : > { %p583_p13 = pnand %p582_p10, %p578_p6 }
  0x33   : > { %520 = vset.pattern.permute.xlu0 %v643_v0 }
  0x7d   : > { %v271_v39 = vpop.permute.xlu2 %270 }
  0x94   : > { %v222_v7 = vpop.permute.xlu0 %221 }
  0x95   : > { %v248_v8 = vpop.permute.xlu1 %247  ;;  %v224_v27 = vmul.f32 %v222_v7, %v217_v17  ;;  %v225_v28 = vmul.f32 %v222_v7, %v218_v18  ;;  %v314_v7 = vld.sshfl [vmem:[#allocation1] sm:$0xff pattern:$0x75316420] }
  0x96   : > { %v250_v31 = vmul.f32 %v248_v8, %v244_v21  ;;  %v251_v32 = vmul.f32 %v248_v8, %v245_v22 }
  0x9d   : > { %v234_v25 = vpop.permute.xlu0 %233 }
  0x9e   : > { %v262_v26 = vpop.permute.xlu1 %261  ;;  %v236_v29 = vmul.f32 %v234_v25, %v230_v19  ;;  %v237_v30 = vmul.f32 %v234_v25, %v231_v20 }
  0x9f   : > { %v264_v35 = vmul.f32 %v262_v26, %v258_v23  ;;  %v265_v36 = vmul.f32 %v262_v26, %v259_v24 }
  0xa0   : > { %v238_v33 = vadd.f32 %v236_v29, %v224_v27  ;;  %v239_v34 = vadd.f32 %v237_v30, %v225_v28 }
  0xa2   : > { %v252_v37 = vadd.f32 %v250_v31, %v238_v33  ;;  %v253_v38 = vadd.f32 %v251_v32, %v239_v34 }
  0xa4   : > { %v266_v40 = vadd.f32 %v264_v35, %v252_v37  ;;  %v267_v41 = vadd.f32 %v265_v36, %v253_v38 }
  0xa6   : > { %v273_v42 = vadd.f32 %v271_v39, %v266_v40  ;;  %v274_v43 = vadd.f32 %v271_v39, %v267_v41 }
  0xa8   : > { %v440_v44 = vmul.f32 -1.442695, %v273_v42  ;;  %v441_v45 = vmul.f32 -1.442695, %v274_v43 }
  0xaa   : > { %521 = vpow2.f32 %v440_v44 }
  0xab   : > { %523 = vpow2.f32 %v441_v45 }
  0xb0   : > { %v522_v46 = vpop.eup %521 }
  0xb1   : > { %v524_v47 = vpop.eup %523  ;;  %v281_v48 = vadd.f32 1.0, %v522_v46 }
  0xb2   : > { %v282_v49 = vadd.f32 1.0, %v524_v47 }
  0xb3   : > { %525 = vrcp.f32 %v281_v48  ;;  %v294_v57 = vand.u32 2147483648, %v281_v48  ;;  %v292_v59 = vand.u32 2147483647, %v281_v48  ;;  %vm288_vm2 = vweird.f32 %v281_v48 }
  0xb4   : > { %527 = vrcp.f32 %v282_v49  ;;  %v309_v58 = vand.u32 2147483648, %v282_v49  ;;  %v307_v61 = vand.u32 2147483647, %v282_v49  ;;  %vm303_vm4 = vweird.f32 %v282_v49 }
  0xb5   : > { %v295_v0 = vor.u32 1.1754944e-38, %v294_v57  ;;  %vm293_vm6 = vcmp.eq.f32.partialorder %v292_v59, 8.507059e+37 }
  0xb6   : > { %v310_v1 = vor.u32 1.1754944e-38, %v309_v58  ;;  %vm308_vm7 = vcmp.eq.f32.partialorder %v307_v61, 8.507059e+37 }
  0xb9   : > { %v526_v50 = vpop.eup %525 }
  0xba   : > { %v528_v51 = vpop.eup %527  ;;  %v284_v52 = vmul.f32 %v526_v50, %v281_v48  ;;  %vm289_vm0 = vweird.f32 %v526_v50 }
  0xbb   : > { %v299_v53 = vmul.f32 %v528_v51, %v282_v49  ;;  %vm304_vm1 = vweird.f32 %v528_v51  ;;  %vm290_vm3 = vmor %vm288_vm2, %vm289_vm0 }
  0xbc   : > { %v285_v54 = vsub.f32 1.0, %v284_v52  ;;  %vm305_vm5 = vmor %vm303_vm4, %vm304_vm1 }
  0xbd   : > { %v300_v55 = vsub.f32 1.0, %v299_v53 }
  0xbe   : > { %v286_v56 = vmul.f32 %v526_v50, %v285_v54 }
  0xbf   : > { %v301_v60 = vmul.f32 %v528_v51, %v300_v55 }
  0xc0   : > { %v287_v62 = vadd.f32 %v526_v50, %v286_v56 }
  0xc1   : > { %v302_v63 = vadd.f32 %v528_v51, %v301_v60 }
  0xc2   : > { %v291_v2 = vsel %vm290_vm3, %v526_v50, %v287_v62 }
  0xc3   : > { %v306_v4 = vsel %vm305_vm5, %v528_v51, %v302_v63  ;;  %v296_v5 = vsel %vm293_vm6, %v295_v0, %v291_v2 }
  0xc4   : > { %v311_v6 = vsel %vm308_vm7, %v310_v1, %v306_v4  ;;  %v318_v9 = vmul.f32 %v314_v7, %v296_v5 }
  0xc5   : > { %v319_v8 = vmul.f32 %v315_v3, %v311_v6 }
  0xc7   : > { %v322_v10 = vrot.slane %v319_v8, 4 }
  0xc9   : > { %v324_v11 = vsel %vm323_vm8, %v318_v9, %v322_v10 }
  0xca   : > { %326 = vst [vmem:[%s206_s15] sm:$0xff] %v324_v11 }
  0xcb   : > { %586 = shalt.err (!%p583_p13)
}
  0xcc   : > { %451 = dma.vmem_to_hbm [thread:$0]  (%p718_p9), %s344_s6, 128, %s346_s7, %s328_s8  }
  0xcd PF: > { %s357_s11 = sand.u32 1, %s621_s12   ;;  %p458_p0 = pnand %p433_p12, %p725_p11 }
  0xce   : > { %s358_s28 = scalar_lea.sflag [#allocation4], %s357_s11 }
  0xcf   : > { %p459_p1 = pneg %p458_p0 }
  0xd1   : > { %616 = dma.done.wait (%p459_p1), %s358_s28, 128  }
  0xd2   : > { %618 = vsyncadd (%p459_p1), %s358_s28, 4294967168  ;;  %s19_s17 = sadd.s32 1, %s641_s17   ;;  %s805_s12 = smov %s625_s13 }
  0xd3   : > { %p16_p2 = scmp.ge.s32.totalorder %s19_s17, 4   ;;  %s806_s13 = smov %s629_s14 }
  0xd4   : > { %s807_s14 = smov %s723_s26  ;;  %s808_s15 = smov %s637_s16 }
  0xd5   : > { %s809_s16 = smov %s811_s20  ;;  %18 = sbr.rel (!%p16_p2) target bundleno = 6 (0x6), region = 77 }
  0xda   :  { %364 = vsyncpa [#allocation3], 1 }
  0xdb   :  { %366 = vsyncpa [#allocation3 + $0x1], 1 }
  0xdc   :  { %367 = vsyncpa [#allocation4], 1 }
  0xdd   :  { %369 = vsyncpa [#allocation4 + $0x1], 1 }

</bundles_post_ra>
